<compile_context>
chip_gen: v6e
topology: v6e:2x2x1
jax: 0.10.0
libtpu: 0.0.40
codegen_flags: <defaults>
</compile_context>

<pallas_src>
import functools

import jax
import jax.numpy as jnp
from jax.experimental import pallas as pl
from jax.experimental.pallas import tpu as pltpu


# ---------------------------------------------------------------------------
# Kernels (per batch tile, accumulating into a resident scalar)
# ---------------------------------------------------------------------------
def _cosine_triplet_kernel(a_ref, p_ref, n_ref, yp_ref, yn_ref, out_ref, acc_ref,
                           *, margin, scale, use_sigmoid, total_b):
    i = pl.program_id(0)

    @pl.when(i == 0)
    def _init():
        acc_ref[...] = jnp.zeros_like(acc_ref)

    a = a_ref[...].astype(jnp.float32)
    p = p_ref[...].astype(jnp.float32)
    n = n_ref[...].astype(jnp.float32)
    if use_sigmoid:
        a = jax.nn.sigmoid(a)
        p = jax.nn.sigmoid(p)
        n = jax.nn.sigmoid(n)

    eps = 1e-8
    # Single pass over the tile: five row reductions, ||a||^2 computed once.
    aa = jnp.sum(a * a, axis=1, keepdims=True)          # (TB, 1)
    pp = jnp.sum(p * p, axis=1, keepdims=True)
    nn_ = jnp.sum(n * n, axis=1, keepdims=True)
    ap = jnp.sum(a * p, axis=1, keepdims=True)
    an = jnp.sum(a * n, axis=1, keepdims=True)

    # cos = dot / (|x| |y|)  ->  dot * rsqrt(|x|^2 |y|^2)   (EUP, not VALU)
    cos_p = ap * jax.lax.rsqrt(jnp.maximum(aa * pp, eps * eps))
    cos_n = an * jax.lax.rsqrt(jnp.maximum(aa * nn_, eps * eps))

    yp = yp_ref[...].astype(jnp.float32)                 # (TB, 1)
    yn = yn_ref[...].astype(jnp.float32)

    def emb_loss(c, y):
        # y == 1 -> 1 - cos ; y == -1 -> max(0, cos - margin)
        return jnp.where(y > 0, 1.0 - c, jnp.maximum(c - margin, 0.0))

    tb = a_ref.shape[0]
    row = i * tb + jax.lax.broadcasted_iota(jnp.int32, (tb, 1), 0)
    valid = row < total_b                                # mask padded rows

    per_row = emb_loss(cos_p, yp) + emb_loss(cos_n, yn)  # (TB, 1)
    acc_ref[...] += jnp.sum(jnp.where(valid, per_row, 0.0))

    @pl.when(i == pl.num_programs(0) - 1)
    def _finalize():
        out_ref[...] = acc_ref[...] * scale


def _euclidean_triplet_kernel(a_ref, p_ref, n_ref, out_ref, acc_ref,
                              *, margin, ratio, scale, use_sigmoid, total_b):
    i = pl.program_id(0)

    @pl.when(i == 0)
    def _init():
        acc_ref[...] = jnp.zeros_like(acc_ref)

    a = a_ref[...].astype(jnp.float32)
    p = p_ref[...].astype(jnp.float32)
    n = n_ref[...].astype(jnp.float32)
    if use_sigmoid:
        a = jax.nn.sigmoid(a)
        p = jax.nn.sigmoid(p)
        n = jax.nn.sigmoid(n)

    dp = a - p
    dn = a - n
    dist_pos = jnp.sum(dp * dp, axis=1, keepdims=True)   # (TB, 1)
    dist_neg = jnp.sum(dn * dn, axis=1, keepdims=True)
    per_row = ratio * jnp.maximum(dist_pos - dist_neg + margin, 0.0)

    tb = a_ref.shape[0]
    row = i * tb + jax.lax.broadcasted_iota(jnp.int32, (tb, 1), 0)
    valid = row < total_b

    acc_ref[...] += jnp.sum(jnp.where(valid, per_row, 0.0))

    @pl.when(i == pl.num_programs(0) - 1)
    def _finalize():
        out_ref[...] = acc_ref[...] * scale


# ---------------------------------------------------------------------------
# Wrapper
# ---------------------------------------------------------------------------
def _pick_batch_tile(B, D, itemsize):
    # 3 inputs x 2 pipeline buffers; stay under ~12 MiB so it fits v5e's 16 MiB
    # scoped-VMEM default and leaves plenty of headroom on v7x (64 MiB physical).
    budget = 12 * 1024 * 1024
    rows = budget // max(3 * 2 * D * itemsize, 1)
    rows = min(int(rows), 512)          # ~85% of HBM roofline reached by ~512 rows
    rows = max((rows // 8) * 8, 8)      # keep sublane-aligned
    if rows >= B:
        return B
    return rows


def triplet_loss(anchor, pos, neg, triplet_pos_label, triplet_neg_label,
                 *, method='cosine', ratio=1.0, margin=0.2, use_sigmoid=False,
                 reduction='mean', size_average=True, block_b=None):
    """Pallas TPU implementation of mmfashion TripletLoss.forward (scalar out)."""
    B, D = anchor.shape
    itemsize = jnp.dtype(anchor.dtype).itemsize
    tb = block_b if block_b is not None else _pick_batch_tile(B, D, itemsize)
    tb = min(int(tb), B)
    n_tiles = pl.cdiv(B, tb)

    emb_spec = pl.BlockSpec((tb, D), lambda i: (i, 0))
    lbl_spec = pl.BlockSpec((tb, 1), lambda i: (i, 0))
    out_spec = pl.BlockSpec((1, 1), lambda i: (0, 0))     # resident accumulator tile
    out_shape = jax.ShapeDtypeStruct((1, 1), jnp.float32)

    compiler_params = pltpu.CompilerParams(
        dimension_semantics=("arbitrary",),
        vmem_limit_bytes=32 * 1024 * 1024,
    )
    cost = pl.CostEstimate(
        flops=10 * B * D,
        transcendentals=(3 * B * D if use_sigmoid else 0) + 2 * B,
        bytes_accessed=3 * B * D * itemsize + 2 * B * 4 + 4,
    )

    if method == 'cosine':
        if reduction not in ('mean', 'sum'):
            # TODO(synk): reduction='none' needs a per-sample (B,) output kernel;
            # the scalar-output kernel below cannot represent it.
            raise NotImplementedError("reduction='none' is not supported")
        scale = (1.0 / B) if reduction == 'mean' else 1.0
        yp = triplet_pos_label.astype(jnp.float32).reshape(B, 1)
        yn = triplet_neg_label.astype(jnp.float32).reshape(B, 1)
        kernel = functools.partial(
            _cosine_triplet_kernel, margin=float(margin), scale=float(scale),
            use_sigmoid=bool(use_sigmoid), total_b=int(B))
        out = pl.pallas_call(
            kernel,
            out_shape=out_shape,
            grid=(n_tiles,),
            in_specs=[emb_spec, emb_spec, emb_spec, lbl_spec, lbl_spec],
            out_specs=out_spec,
            scratch_shapes=[pltpu.VMEM((1, 1), jnp.float32)],
            compiler_params=compiler_params,
            cost_estimate=cost,
        )(anchor, pos, neg, yp, yn)
    else:
        scale = (1.0 / B) if size_average else 1.0
        kernel = functools.partial(
            _euclidean_triplet_kernel, margin=float(margin), ratio=float(ratio),
            scale=float(scale), use_sigmoid=bool(use_sigmoid), total_b=int(B))
        out = pl.pallas_call(
            kernel,
            out_shape=out_shape,
            grid=(n_tiles,),
            in_specs=[emb_spec, emb_spec, emb_spec],
            out_specs=out_spec,
            scratch_shapes=[pltpu.VMEM((1, 1), jnp.float32)],
            compiler_params=compiler_params,
            cost_estimate=cost,
        )(anchor, pos, neg)

    return out[0, 0]


# ---------------------------------------------------------------------------
# Pure-JAX references (sanity checks)
# ---------------------------------------------------------------------------
def _ref_cosine(anchor, pos, neg, yp, yn, margin=0.2):
    def cos(x, y):
        num = jnp.sum(x * y, axis=1)
        den = jnp.linalg.norm(x, axis=1) * jnp.linalg.norm(y, axis=1)
        return num / jnp.maximum(den, 1e-8)

    def emb(c, y):
        return jnp.where(y > 0, 1.0 - c, jnp.maximum(c - margin, 0.0))

    return jnp.mean(emb(cos(anchor, pos), yp)) + jnp.mean(emb(cos(anchor, neg), yn))


def _ref_euclid(anchor, pos, neg, margin=0.2, ratio=1.0, size_average=True):
    dp = jnp.sum((anchor - pos) ** 2, axis=1)
    dn = jnp.sum((anchor - neg) ** 2, axis=1)
    l = ratio * jnp.maximum(dp - dn + margin, 0.0)
    return jnp.mean(l) if size_average else jnp.sum(l)


# ---------------------------------------------------------------------------
if __name__ == "__main__":
    key = jax.random.PRNGKey(0)
    B, D = 20, 32            # B deliberately not a multiple of the forced tile
    k1, k2, k3 = jax.random.split(key, 3)
    anchor = jax.random.normal(k1, (B, D), dtype=jnp.float32)
    pos = jax.random.normal(k2, (B, D), dtype=jnp.float32)
    neg = jax.random.normal(k3, (B, D), dtype=jnp.float32)
    triplet_pos_label = jnp.ones((B,), dtype=jnp.float32)    # +1 : similar
    triplet_neg_label = -jnp.ones((B,), dtype=jnp.float32)   # -1 : dissimilar

    # 1) default config (cosine / margin=0.2 / mean), auto tile (single tile here)
    loss = jax.block_until_ready(
        triplet_loss(anchor, pos, neg, triplet_pos_label, triplet_neg_label))
    ref = _ref_cosine(anchor, pos, neg, triplet_pos_label, triplet_neg_label)
    assert jnp.allclose(loss, ref, atol=1e-5, rtol=1e-5), (loss, ref)

    # 2) force multi-tile path (TB=8 -> 3 tiles, last tile partially masked)
    loss_t = jax.block_until_ready(
        triplet_loss(anchor, pos, neg, triplet_pos_label, triplet_neg_label,
                     block_b=8))
    assert jnp.allclose(loss_t, ref, atol=1e-5, rtol=1e-5), (loss_t, ref)

    # 3) euclidean branch, also multi-tile
    loss_e = jax.block_until_ready(
        triplet_loss(anchor, pos, neg, triplet_pos_label, triplet_neg_label,
                     method='euclidean', block_b=8))
    ref_e = _ref_euclid(anchor, pos, neg)
    assert jnp.allclose(loss_e, ref_e, atol=1e-5, rtol=1e-5), (loss_e, ref_e)

    print("KERNEL_OK")
</pallas_src>

<mosaic_0001>
module attributes {stable_mosaic.version = 11 : i64} {
  func.func @_cosine_triplet_kernel(%arg0: i32, %arg1: memref<20x32xf32, #tpu.memory_space<vmem>>, %arg2: memref<20x32xf32, #tpu.memory_space<vmem>>, %arg3: memref<20x32xf32, #tpu.memory_space<vmem>>, %arg4: memref<20x1xf32, #tpu.memory_space<vmem>>, %arg5: memref<20x1xf32, #tpu.memory_space<vmem>>, %arg6: memref<1x1xf32, #tpu.memory_space<vmem>>, %arg7: memref<1x1xf32, #tpu.memory_space<vmem>>) attributes {dimension_semantics = [#tpu.dimension_semantics<arbitrary>], iteration_bounds = array<i64: 1>, scalar_prefetch = 0 : i64, scratch_operands = 1 : i64, tpu.core_type = #tpu.core_type<tc>, window_params = [{transform_indices = @transform_0, window_bounds = array<i64: 20, 32>}, {transform_indices = @transform_1, window_bounds = array<i64: 20, 32>}, {transform_indices = @transform_2, window_bounds = array<i64: 20, 32>}, {transform_indices = @transform_3, window_bounds = array<i64: 20, 1>}, {transform_indices = @transform_4, window_bounds = array<i64: 20, 1>}, {pipeline_mode = #tpu.pipeline_mode<synchronous>, transform_indices = @transform_5, window_bounds = array<i64: 1, 1>}]} {
    %c0_i32 = arith.constant 0 : i32
    %0 = arith.cmpi eq, %arg0, %c0_i32 : i32
    %1 = arith.extui %0 : i1 to i32
    %c0_i32_0 = arith.constant 0 : i32
    %2 = arith.cmpi ne, %1, %c0_i32_0 : i32
    scf.if %2 {
      %cst_33 = arith.constant 0.000000e+00 : f32
      %71 = vector.broadcast %cst_33 : f32 to vector<1x1xf32>
      %c0_34 = arith.constant 0 : index
      %c0_35 = arith.constant 0 : index
      %72 = vector.load %arg7[%c0_34, %c0_35] : memref<1x1xf32, #tpu.memory_space<vmem>>, vector<1x1xf32>
      tpu.vector_store %arg7[%c0_34, %c0_35], %71 {strides = array<i32>} : memref<1x1xf32, #tpu.memory_space<vmem>>, vector<1x1xf32>,
    } else {
    }
    %c0 = arith.constant 0 : index
    %c0_1 = arith.constant 0 : index
    %3 = vector.load %arg1[%c0, %c0_1] : memref<20x32xf32, #tpu.memory_space<vmem>>, vector<20x32xf32>
    %c0_2 = arith.constant 0 : index
    %c0_3 = arith.constant 0 : index
    %4 = vector.load %arg2[%c0_2, %c0_3] : memref<20x32xf32, #tpu.memory_space<vmem>>, vector<20x32xf32>
    %c0_4 = arith.constant 0 : index
    %c0_5 = arith.constant 0 : index
    %5 = vector.load %arg3[%c0_4, %c0_5] : memref<20x32xf32, #tpu.memory_space<vmem>>, vector<20x32xf32>
    %6 = arith.mulf %3, %3 : vector<20x32xf32>
    %cst = arith.constant dense<0.000000e+00> : vector<20xf32>
    %7 = vector.multi_reduction <add>, %6, %cst [1] : vector<20x32xf32> to vector<20xf32>
    %8 = vector.shape_cast %7 : vector<20xf32> to vector<20x1xf32>
    %9 = arith.mulf %4, %4 : vector<20x32xf32>
    %cst_6 = arith.constant dense<0.000000e+00> : vector<20xf32>
    %10 = vector.multi_reduction <add>, %9, %cst_6 [1] : vector<20x32xf32> to vector<20xf32>
    %11 = vector.shape_cast %10 : vector<20xf32> to vector<20x1xf32>
    %12 = arith.mulf %5, %5 : vector<20x32xf32>
    %cst_7 = arith.constant dense<0.000000e+00> : vector<20xf32>
    %13 = vector.multi_reduction <add>, %12, %cst_7 [1] : vector<20x32xf32> to vector<20xf32>
    %14 = vector.shape_cast %13 : vector<20xf32> to vector<20x1xf32>
    %15 = arith.mulf %3, %4 : vector<20x32xf32>
    %cst_8 = arith.constant dense<0.000000e+00> : vector<20xf32>
    %16 = vector.multi_reduction <add>, %15, %cst_8 [1] : vector<20x32xf32> to vector<20xf32>
    %17 = vector.shape_cast %16 : vector<20xf32> to vector<20x1xf32>
    %18 = arith.mulf %3, %5 : vector<20x32xf32>
    %cst_9 = arith.constant dense<0.000000e+00> : vector<20xf32>
    %19 = vector.multi_reduction <add>, %18, %cst_9 [1] : vector<20x32xf32> to vector<20xf32>
    %20 = vector.shape_cast %19 : vector<20xf32> to vector<20x1xf32>
    %21 = arith.mulf %8, %11 : vector<20x1xf32>
    %cst_10 = arith.constant 1.000000e-16 : f32
    %22 = vector.broadcast %cst_10 : f32 to vector<20x1xf32>
    %23 = arith.maximumf %21, %22 : vector<20x1xf32>
    %24 = math.rsqrt %23 : vector<20x1xf32>
    %25 = arith.mulf %17, %24 : vector<20x1xf32>
    %26 = arith.mulf %8, %14 : vector<20x1xf32>
    %cst_11 = arith.constant 1.000000e-16 : f32
    %27 = vector.broadcast %cst_11 : f32 to vector<20x1xf32>
    %28 = arith.maximumf %26, %27 : vector<20x1xf32>
    %29 = math.rsqrt %28 : vector<20x1xf32>
    %30 = arith.mulf %20, %29 : vector<20x1xf32>
    %c0_12 = arith.constant 0 : index
    %c0_13 = arith.constant 0 : index
    %31 = vector.load %arg4[%c0_12, %c0_13] : memref<20x1xf32, #tpu.memory_space<vmem>>, vector<20x1xf32>
    %c0_14 = arith.constant 0 : index
    %c0_15 = arith.constant 0 : index
    %32 = vector.load %arg5[%c0_14, %c0_15] : memref<20x1xf32, #tpu.memory_space<vmem>>, vector<20x1xf32>
    %c20_i32 = arith.constant 20 : i32
    %33 = arith.muli %arg0, %c20_i32 : i32
    %34 = tpu.iota {dimensions = array<i32: 0>} : vector<20x1xi32>
    %35 = vector.broadcast %33 : i32 to vector<20x1xi32>
    %36 = arith.addi %35, %34 : vector<20x1xi32>
    %c20_i32_16 = arith.constant 20 : i32
    %37 = vector.broadcast %c20_i32_16 : i32 to vector<20x1xi32>
    %38 = arith.cmpi slt, %36, %37 : vector<20x1xi32>
    %cst_17 = arith.constant 0.000000e+00 : f32
    %39 = vector.broadcast %cst_17 : f32 to vector<20x1xf32>
    %40 = arith.cmpf ogt, %31, %39 : vector<20x1xf32>
    %cst_18 = arith.constant 1.000000e+00 : f32
    %41 = vector.broadcast %cst_18 : f32 to vector<20x1xf32>
    %42 = arith.subf %41, %25 : vector<20x1xf32>
    %cst_19 = arith.constant 2.000000e-01 : f32
    %43 = vector.broadcast %cst_19 : f32 to vector<20x1xf32>
    %44 = arith.subf %25, %43 : vector<20x1xf32>
    %cst_20 = arith.constant 0.000000e+00 : f32
    %45 = vector.broadcast %cst_20 : f32 to vector<20x1xf32>
    %46 = arith.maximumf %44, %45 : vector<20x1xf32>
    %47 = arith.select %40, %42, %46 : vector<20x1xi1>, vector<20x1xf32>
    %cst_21 = arith.constant 0.000000e+00 : f32
    %48 = vector.broadcast %cst_21 : f32 to vector<20x1xf32>
    %49 = arith.cmpf ogt, %32, %48 : vector<20x1xf32>
    %cst_22 = arith.constant 1.000000e+00 : f32
    %50 = vector.broadcast %cst_22 : f32 to vector<20x1xf32>
    %51 = arith.subf %50, %30 : vector<20x1xf32>
    %cst_23 = arith.constant 2.000000e-01 : f32
    %52 = vector.broadcast %cst_23 : f32 to vector<20x1xf32>
    %53 = arith.subf %30, %52 : vector<20x1xf32>
    %cst_24 = arith.constant 0.000000e+00 : f32
    %54 = vector.broadcast %cst_24 : f32 to vector<20x1xf32>
    %55 = arith.maximumf %53, %54 : vector<20x1xf32>
    %56 = arith.select %49, %51, %55 : vector<20x1xi1>, vector<20x1xf32>
    %57 = arith.addf %47, %56 : vector<20x1xf32>
    %c0_25 = arith.constant 0 : index
    %c0_26 = arith.constant 0 : index
    %58 = vector.load %arg7[%c0_25, %c0_26] : memref<1x1xf32, #tpu.memory_space<vmem>>, vector<1x1xf32>
    %cst_27 = arith.constant 0.000000e+00 : f32
    %59 = vector.broadcast %cst_27 : f32 to vector<20x1xf32>
    %60 = arith.select %38, %57, %59 : vector<20x1xi1>, vector<20x1xf32>
    %61 = vector.shape_cast %60 : vector<20x1xf32> to vector<1x20x1xf32>
    %cst_28 = arith.constant dense<0.000000e+00> : vector<1xf32>
    %62 = vector.multi_reduction <add>, %61, %cst_28 [1, 2] : vector<1x20x1xf32> to vector<1xf32>
    %63 = vector.shape_cast %62 : vector<1xf32> to vector<1x1x1xf32>
    %64 = vector.extract %63[0, 0, 0] : f32 from vector<1x1x1xf32>
    %65 = vector.broadcast %64 : f32 to vector<1x1xf32>
    %66 = arith.addf %58, %65 : vector<1x1xf32>
    %c0_29 = arith.constant 0 : index
    %c0_30 = arith.constant 0 : index
    %67 = vector.load %arg7[%c0_29, %c0_30] : memref<1x1xf32, #tpu.memory_space<vmem>>, vector<1x1xf32>
    tpu.vector_store %arg7[%c0_29, %c0_30], %66 {strides = array<i32>} : memref<1x1xf32, #tpu.memory_space<vmem>>, vector<1x1xf32>,
    %c0_i32_31 = arith.constant 0 : i32
    %68 = arith.cmpi eq, %arg0, %c0_i32_31 : i32
    %69 = arith.extui %68 : i1 to i32
    %c0_i32_32 = arith.constant 0 : i32
    %70 = arith.cmpi ne, %69, %c0_i32_32 : i32
    scf.if %70 {
      %c0_33 = arith.constant 0 : index
      %c0_34 = arith.constant 0 : index
      %71 = vector.load %arg7[%c0_33, %c0_34] : memref<1x1xf32, #tpu.memory_space<vmem>>, vector<1x1xf32>
      %cst_35 = arith.constant 5.000000e-02 : f32
      %72 = vector.broadcast %cst_35 : f32 to vector<1x1xf32>
      %73 = arith.mulf %71, %72 : vector<1x1xf32>
      %c0_36 = arith.constant 0 : index
      %c0_37 = arith.constant 0 : index
      %74 = vector.load %arg6[%c0_36, %c0_37] : memref<1x1xf32, #tpu.memory_space<vmem>>, vector<1x1xf32>
      tpu.vector_store %arg6[%c0_36, %c0_37], %73 {strides = array<i32>} : memref<1x1xf32, #tpu.memory_space<vmem>>, vector<1x1xf32>,
    } else {
    }
    return
  }
  func.func @transform_0(%arg0: i32) -> (i32, i32) {
    %c0_i32 = arith.constant 0 : i32
    %c0_i32_0 = arith.constant 0 : i32
    return %arg0, %c0_i32 : i32, i32
  }
  func.func @transform_1(%arg0: i32) -> (i32, i32) {
    %c0_i32 = arith.constant 0 : i32
    %c0_i32_0 = arith.constant 0 : i32
    return %arg0, %c0_i32 : i32, i32
  }
  func.func @transform_2(%arg0: i32) -> (i32, i32) {
    %c0_i32 = arith.constant 0 : i32
    %c0_i32_0 = arith.constant 0 : i32
    return %arg0, %c0_i32 : i32, i32
  }
  func.func @transform_3(%arg0: i32) -> (i32, i32) {
    %c0_i32 = arith.constant 0 : i32
    %c0_i32_0 = arith.constant 0 : i32
    return %arg0, %c0_i32 : i32, i32
  }
  func.func @transform_4(%arg0: i32) -> (i32, i32) {
    %c0_i32 = arith.constant 0 : i32
    %c0_i32_0 = arith.constant 0 : i32
    return %arg0, %c0_i32 : i32, i32
  }
  func.func @transform_5(%arg0: i32) -> (i32, i32) {
    %c0_i32 = arith.constant 0 : i32
    %c0_i32_0 = arith.constant 0 : i32
    %c0_i32_1 = arith.constant 0 : i32
    return %c0_i32, %c0_i32_0 : i32, i32
  }
}

</mosaic_0001>

<bundles_post_ra>
// kernel: tpu_custom_call.1
= control target key start
LH: loop header
LB: loop body
LE: loop exit
PB: predicated region body
PF: predicated region fallthrough
CT: control target
= control target key end

     0   :  { %10 = vsyncpa [#allocation4], 0  ;;  %s398_s0 = inlined_call_operand.vmem [shape: f32[20,32], index: 0, kind: input, shape index: {}]   ;;  %s399_s1 = inlined_call_operand.vmem [shape: f32[20,32], index: 1, kind: input, shape index: {}]   ;;  %s400_s2 = inlined_call_operand.hbm [shape: f32[20,32], index: 2, kind: input, shape index: {}]   ;;  %s401_s3 = inlined_call_operand.vmem [shape: f32[20,1], index: 3, kind: input, shape index: {}]   ;;  %s402_s4 = inlined_call_operand.vmem [shape: f32[20,1], index: 4, kind: input, shape index: {}]   ;;  %s403_s5 = inlined_call_operand.hbm [shape: f32[1,1], index: 5, kind: output, shape index: {}]  }
   0x1   :  { %11 = vsyncpa [#allocation5], 0  ;;  %s301_s18 = smov [#allocation3]  }
   0x2   :  { %s21_s19 = sshll.u32 %s301_s18, 4  ;;  %s22_s19 = int_to_ptr.vmem [resolvable:$true] %s21_s19 }
   0x3   :  { %s265_s20 = scalar_lea.vmem %s22_s19, 384  ;;  %p270_p1 = scmp.lt.s32.totalorder %s22_s19, %s22_s19 }
   0x4   :  { %p266_p0 = scmp.ne.s32.totalorder %s22_s19, %s265_s20  ;;  %p271_p2 = scmp.lt.s32.totalorder %s265_s20, %s265_s20 }
   0x6   :  { %p272_p3 = por %p271_p2, %p270_p1 }
   0x8   :  { %p273_p4 = pnand %p272_p3, %p266_p0 }
   0xa   :  { %276 = shalt.err (!%p273_p4)
}
   0xb   :  { %s302_s21 = smov 128   ;;  %s303_s22 = smov 8  }
   0xc   :  { %27 = dma.hbm_to_vmem [thread:$0]  %s400_s2, 384, %s22_s19, [#allocation4], %s302_s21, %s302_s21, %s303_s22  }
   0xd   :  { %297 = dma.done.wait [#allocation4], 384  }
   0xe   :  { %298 = vsyncadd [#allocation4], 4294966912  ;;  %v44_v0 = vld [vmem:[%s399_s1] sm:$0xff]  ;;  %vm53_vm0 = vcmask 261120   ;;  %v45_v2 = vld [vmem:[%s399_s1 + $0x8] sm:$0xff]  ;;  %vm60_vm1 = vcmask 257024  }
   0xf   :  { %v41_v1 = vld [vmem:[%s398_s0] sm:$0xff]  ;;  %v64_v3 = vmul.f32 %v44_v0, %v44_v0  ;;  %v65_v5 = vmul.f32 %v45_v2, %v45_v2  ;;  %v42_v6 = vld [vmem:[%s398_s0 + $0x8] sm:$0xff]  ;;  %v46_v16 = vld [vmem:[%s399_s1 + $0x10] sm:$0xf]  ;;  %vm191_vm8 = vcmask 7168   ;;  %vm195_vm10 = vcmask 3072  }
  0x10   :  { %v50_v4 = vmul.f32 %v41_v1, %v41_v1  ;;  %v51_v7 = vmul.f32 %v42_v6, %v42_v6  ;;  %v48_v8 = vld [vmem:[#allocation3 + $0x8] sm:$0xff]  ;;  %v47_v9 = vld [vmem:[#allocation3] sm:$0xff]  ;;  %v66_v20 = vmul.f32 %v46_v16, %v46_v16  ;;  %v49_v22 = vld [vmem:[#allocation3 + $0x10] sm:$0xf]  ;;  %v88_v26 = vmul.f32 %v44_v0, %v41_v1 }
  0x11   :  { %v67_v10 = vsel %vm53_vm0, %v64_v3, 0.0  ;;  %v70_v12 = vsel %vm53_vm0, %v65_v5, 0.0  ;;  %v77_v14 = vmul.f32 %v48_v8, %v48_v8  ;;  %v76_v15 = vmul.f32 %v47_v9, %v47_v9  ;;  %v43_v17 = vld [vmem:[%s398_s0 + $0x10] sm:$0xf] }
  0x12   :  { %v54_v11 = vsel %vm53_vm0, %v50_v4, 0.0  ;;  %68 = vadd.xlane.f32.xlu1 %v67_v10  ;;  %v57_v13 = vsel %vm53_vm0, %v51_v7, 0.0  ;;  %v52_v21 = vmul.f32 %v43_v17, %v43_v17  ;;  %v73_v23 = vsel %vm60_vm1, %v66_v20, 0.0  ;;  %v139_v7 = vld [vmem:[%s402_s4] sm:$0xff] }
  0x13   :  { %55 = vadd.xlane.f32.xlu0 %v54_v11  ;;  %v82_v18 = vsel %vm53_vm0, %v77_v14, 0.0  ;;  %v79_v19 = vsel %vm53_vm0, %v76_v15, 0.0  ;;  %v78_v25 = vmul.f32 %v49_v22, %v49_v22  ;;  %v91_v28 = vsel %vm53_vm0, %v88_v26, 0.0 }
  0x14   :  { %v61_v24 = vsel %vm60_vm1, %v52_v21, 0.0  ;;  %v89_v29 = vmul.f32 %v45_v2, %v42_v6  ;;  %v100_v30 = vmul.f32 %v47_v9, %v41_v1  ;;  %v101_v33 = vmul.f32 %v48_v8, %v42_v6  ;;  %v140_v8 = vld [vmem:[%s402_s4 + $0x8] sm:$0xff] }
  0x15   :  { %v85_v27 = vsel %vm60_vm1, %v78_v25, 0.0  ;;  %v90_v34 = vmul.f32 %v46_v16, %v43_v17  ;;  %v102_v37 = vmul.f32 %v49_v22, %v43_v17  ;;  %v143_v10 = vlaneseq  ;;  %v136_v16 = vld [vmem:[%s401_s3] sm:$0xff]  ;;  %v137_v17 = vld [vmem:[%s401_s3 + $0x8] sm:$0xff] }
  0x16   :  { %71 = vadd.xlane.f32.xlu1 %v70_v12  ;;  %v94_v31 = vsel %vm53_vm0, %v89_v29, 0.0  ;;  %v103_v32 = vsel %vm53_vm0, %v100_v30, 0.0  ;;  %v106_v35 = vsel %vm53_vm0, %v101_v33, 0.0  ;;  %vm169_vm2 = vcmp.gt.f32.partialorder %v139_v7, 0.0 }
  0x17   :  { %58 = vadd.xlane.f32.xlu0 %v57_v13  ;;  %v97_v36 = vsel %vm60_vm1, %v90_v34, 0.0  ;;  %v109_v38 = vsel %vm60_vm1, %v102_v37, 0.0  ;;  %vm170_vm3 = vcmp.gt.f32.partialorder %v140_v8, 0.0  ;;  %v144_v22 = vshrl.u32 %v143_v10, 7 }
  0x18   :  { %vm154_vm4 = vcmp.gt.f32.partialorder %v136_v16, 0.0  ;;  %vm155_vm5 = vcmp.gt.f32.partialorder %v137_v17, 0.0  ;;  %vm39_vm11 = vcmask 0  }
  0x1a   :  { %83 = vadd.xlane.f32.xlu1 %v82_v18 }
  0x1b   :  { %80 = vadd.xlane.f32.xlu0 %v79_v19 }
  0x1e   :  { %74 = vadd.xlane.f32.xlu1 %v73_v23 }
  0x1f   :  { %62 = vadd.xlane.f32.xlu0 %v61_v24 }
  0x22   :  { %92 = vadd.xlane.f32.xlu1 %v91_v28 }
  0x23   :  { %86 = vadd.xlane.f32.xlu0 %v85_v27 }
  0x26   :  { %104 = vadd.xlane.f32.xlu1 %v103_v32 }
  0x27   :  { %95 = vadd.xlane.f32.xlu0 %v94_v31 }
  0x2a   :  { %98 = vadd.xlane.f32.xlu1 %v97_v36  ;;  %v141_v36 = vld [vmem:[%s402_s4 + $0x10] sm:$0xf]  ;;  %s305_s4 = smov [#allocation6]  }
  0x2b   :  { %107 = vadd.xlane.f32.xlu0 %v106_v35  ;;  %v138_v35 = vld [vmem:[%s401_s3 + $0x10] sm:$0xf]  ;;  %vm171_vm7 = vcmp.gt.f32.partialorder %v141_v36, 0.0  ;;  %s223_s21 = sshll.u32 %s305_s4, 4  ;;  %s224_s21 = int_to_ptr.vmem [resolvable:$true] %s223_s21 }
  0x2c   :  { %vm156_vm6 = vcmp.gt.f32.partialorder %v138_v35, 0.0  ;;  %s277_s22 = scalar_lea.vmem %s224_s21, 16  ;;  %s281_s23 = scalar_lea.vmem %s224_s21, 32 }
  0x2d   :  { %p278_p5 = scmp.ne.s32.totalorder %s224_s21, %s277_s22  ;;  %p282_p6 = scmp.lt.s32.totalorder %s224_s21, %s224_s21 }
  0x2e   :  { %p283_p7 = scmp.lt.s32.totalorder %s281_s23, %s277_s22 }
  0x2f   :  { %110 = vadd.xlane.f32.xlu0 %v109_v38 }
  0x30   :  { %p284_p8 = por %p283_p7, %p282_p6 }
  0x32   :  { %p285_p9 = pnand %p284_p8, %p278_p5 }
  0x9b   :  { %v69_v39 = vpop.xlane.xlu1 %68 }
  0x9c   :  { %v56_v40 = vpop.xlane.xlu0 %55 }
  0x9d   :  { %v112_v41 = vmul.f32 %v69_v39, %v56_v40  ;;  %v146_v39 = vadd.s32 16, %v144_v22 }
  0x9f   :  { %v115_v42 = vmax.f32 %v112_v41, 1e-16  ;;  %v72_v43 = vpop.xlane.xlu1 %71  ;;  %vm153_vm9 = vcmp.lt.s32.totalorder %v146_v39, 20 }
  0xa0   :  { %v59_v44 = vpop.xlane.xlu0 %58 }
  0xa1   :  { %v113_v45 = vmul.f32 %v72_v43, %v59_v44  ;;  %245 = vrsqrt.f32 %v115_v42 }
  0xa3   :  { %v116_v46 = vmax.f32 %v113_v45, 1e-16  ;;  %v84_v47 = vpop.xlane.xlu1 %83 }
  0xa4   :  { %v81_v48 = vpop.xlane.xlu0 %80  ;;  %v125_v49 = vmul.f32 %v84_v47, %v59_v44 }
  0xa5   :  { %247 = vrsqrt.f32 %v116_v46  ;;  %v124_v50 = vmul.f32 %v81_v48, %v56_v40 }
  0xa6   :  { %v128_v51 = vmax.f32 %v125_v49, 1e-16 }
  0xa7   :  { %v127_v52 = vmax.f32 %v124_v50, 1e-16  ;;  %v75_v53 = vpop.xlane.xlu1 %74 }
  0xa8   :  { %v63_v54 = vpop.xlane.xlu0 %62  ;;  %249 = vrsqrt.f32 %v128_v51 }
  0xa9   :  { %v114_v55 = vmul.f32 %v75_v53, %v63_v54  ;;  %251 = vrsqrt.f32 %v127_v52 }
  0xab   :  { %v117_v56 = vmax.f32 %v114_v55, 1e-16  ;;  %v93_v59 = vpop.xlane.xlu1 %92 }
  0xac   :  { %v87_v57 = vpop.xlane.xlu0 %86 }
  0xad   :  { %253 = vrsqrt.f32 %v117_v56  ;;  %v126_v58 = vmul.f32 %v87_v57, %v63_v54  ;;  %v304_v56 = vmov 0.0  }
  0xae   :  { %v246_v61 = vpop.eup %245  ;;  %40 = vst.msk [vmem:[#allocation2] sm:$0x1] %vm39_vm11, %v304_v56 }
  0xaf   :  { %v129_v60 = vmax.f32 %v126_v58, 1e-16  ;;  %v105_v0 = vpop.xlane.xlu1 %104  ;;  %v121_v1 = vmul.f32 %v246_v61, %v93_v59 }
  0xb0   :  { %v96_v62 = vpop.xlane.xlu0 %95 }
  0xb1   :  { %255 = vrsqrt.f32 %v129_v60  ;;  %v232_v6 = vadd.f32 -0.2, %v121_v1  ;;  %v157_v30 = vsub.f32 1.0, %v121_v1 }
  0xb2   :  { %v248_v63 = vpop.eup %247 }
  0xb3   :  { %v122_v2 = vmul.f32 %v248_v63, %v96_v62  ;;  %v99_v13 = vpop.xlane.xlu1 %98  ;;  %v163_v19 = vmax.f32 %v232_v6, 0.0 }
  0xb4   :  { %v108_v3 = vpop.xlane.xlu0 %107 }
  0xb5   :  { %v250_v4 = vpop.eup %249  ;;  %v233_v11 = vadd.f32 -0.2, %v122_v2  ;;  %v158_v31 = vsub.f32 1.0, %v122_v2  ;;  %v166_v37 = vsel %vm154_vm4, %v157_v30, %v163_v19 }
  0xb6   :  { %v252_v5 = vpop.eup %251  ;;  %v134_v9 = vmul.f32 %v250_v4, %v108_v3 }
  0xb7   :  { %v133_v12 = vmul.f32 %v252_v5, %v105_v0  ;;  %v164_v23 = vmax.f32 %v233_v11, 0.0  ;;  %v187_v0 = vld [vmem:[#allocation2] sm:$0x1] }
  0xb8   :  { %v236_v14 = vadd.f32 -0.2, %v134_v9  ;;  %v173_v26 = vsub.f32 1.0, %v134_v9  ;;  %v111_v27 = vpop.xlane.xlu0 %110 }
  0xb9   :  { %v235_v18 = vadd.f32 -0.2, %v133_v12  ;;  %v172_v24 = vsub.f32 1.0, %v133_v12  ;;  %v167_v38 = vsel %vm155_vm5, %v158_v31, %v164_v23 }
  0xba   :  { %v254_v15 = vpop.eup %253  ;;  %v179_v20 = vmax.f32 %v236_v14, 0.0 }
  0xbb   :  { %v123_v21 = vmul.f32 %v254_v15, %v99_v13  ;;  %v178_v25 = vmax.f32 %v235_v18, 0.0 }
  0xbc   :  { %v182_v33 = vsel %vm170_vm3, %v173_v26, %v179_v20 }
  0xbd   :  { %v234_v28 = vadd.f32 -0.2, %v123_v21  ;;  %v181_v32 = vsel %vm169_vm2, %v172_v24, %v178_v25  ;;  %v185_v43 = vadd.f32 %v182_v33, %v167_v38  ;;  %v159_v44 = vsub.f32 1.0, %v123_v21 }
  0xbe   :  { %v256_v29 = vpop.eup %255  ;;  %v184_v42 = vadd.f32 %v181_v32, %v166_v37 }
  0xbf   :  { %v135_v34 = vmul.f32 %v256_v29, %v111_v27  ;;  %v165_v40 = vmax.f32 %v234_v28, 0.0  ;;  %v193_v50 = vsel %vm191_vm8, %v185_v43, 0.0 }
  0xc0   :  { %v192_v49 = vsel %vm191_vm8, %v184_v42, 0.0 }
  0xc1   :  { %v237_v41 = vadd.f32 -0.2, %v135_v34  ;;  %v174_v45 = vsub.f32 1.0, %v135_v34  ;;  %v168_v47 = vsel %vm156_vm6, %v159_v44, %v165_v40  ;;  %v194_v53 = vadd.f32 %v193_v50, %v192_v49 }
  0xc3   :  { %v180_v46 = vmax.f32 %v237_v41, 0.0 }
  0xc5   :  { %v183_v48 = vsel %vm171_vm7, %v174_v45, %v180_v46 }
  0xc6   :  { %v186_v51 = vadd.f32 %v183_v48, %v168_v47 }
  0xc8   :  { %v190_v52 = vsel %vm153_vm9, %v186_v51, 0.0 }
  0xc9   :  { %v196_v54 = vsel %vm195_vm10, %v190_v52, 0.0 }
  0xca   :  { %v197_v55 = vadd.f32 %v196_v54, %v194_v53 }
  0xcc   :  { %198 = vadd.xlane.f32.xlu1 %v197_v55 }
 0x155   :  { %v199_v57 = vpop.xlane.xlu1 %198 }
 0x156   :  { %v200_v58 = vrot.slane %v199_v57, 4 }
 0x158   :  { %v201_v59 = vadd.f32 %v200_v58, %v199_v57 }
 0x15a   :  { %v202_v60 = vrot.slane %v201_v59, 2 }
 0x15c   :  { %v203_v61 = vadd.f32 %v202_v60, %v201_v59 }
 0x15e   :  { %v204_v62 = vrot.slane %v203_v61, 1 }
 0x160   :  { %v205_v63 = vadd.f32 %v204_v62, %v203_v61 }
 0x162   :  { %238 = vpush %v205_v63 }
 0x193   :  { %s239_s3 = spop %238 }
 0x194   :  { %v207_v1 = vstv %s239_s3 }
 0x195   :  { %v208_v2 = vadd.f32 %v207_v1, %v187_v0 }
 0x197   :  { %210 = vst.msk [vmem:[#allocation2] sm:$0x1] %vm39_vm11, %v208_v2 }
 0x19e   :  { %v214_v3 = vld [vmem:[#allocation2] sm:$0x1] }
 0x19f   :  { %v215_v4 = vmul.f32 0.05, %v214_v3 }
 0x1a1   :  { %216 = vst.msk [vmem:[#allocation6] sm:$0x1] %vm39_vm11, %v215_v4 }
 0x1a2   :  { %288 = shalt.err (!%p285_p9)
}
 0x1a3   :  { %226 = dma.vmem_to_hbm [thread:$0]  %s224_s21, 16, %s403_s5, [#allocation5]  }
 0x1a4   :  { %299 = dma.done.wait [#allocation5], 16  }
 0x1a5   :  { %300 = vsyncadd [#allocation5], 4294967280 }
 0x1a6   :  { %230 = vsyncpa [#allocation4], 1 }
 0x1a7   :  { %231 = vsyncpa [#allocation5], 1 }

</bundles_post_ra>
